<compile_context>
chip_gen: v7x
topology: tpu7x:2x2x1
jax: 0.10.0
libtpu: 0.0.40
codegen_flags: <defaults>
</compile_context>

<pallas_src>
import jax
import jax.numpy as jnp
from jax.experimental import pallas as pl
from jax.experimental.pallas import tpu as pltpu


def _round_up(x, m):
    return (x + m - 1) // m * m


def _mynn_block_kernel(x_ref, wT_ref, b_ref, o_ref, acc_ref):
    """One (tm, tn) output tile; K is the innermost (reduction) grid axis."""
    k = pl.program_id(2)

    @pl.when(k == 0)
    def _init():
        acc_ref[...] = jnp.zeros_like(acc_ref)

    # MXU matmul, f32 accumulation.
    acc_ref[...] += jnp.dot(
        x_ref[...], wT_ref[...], preferred_element_type=jnp.float32
    )

    @pl.when(k == pl.num_programs(2) - 1)
    def _finalize():
        y = acc_ref[...] + b_ref[...]          # bias broadcast (1, tn) -> (tm, tn)
        y = jnp.where(y >= 0, y, 0.01 * y)     # LeakyReLU, PyTorch default slope 0.01
        o_ref[...] = y.astype(o_ref.dtype)


def mynn_block(x, weight, bias, *, tm=128, tn=128, tk=512):
    """x: (B, in_dim) f32; weight: (out_dim, in_dim) f32 (nn.Linear layout);
    bias: (out_dim,) f32. Returns (B, out_dim) f32."""
    B, K = x.shape
    N = weight.shape[0]

    # Pre-transpose the weight once in the wrapper (HBM-side; avoids in-kernel XLU).
    wT = weight.T                                  # (K, N)
    b2d = bias.reshape(1, N)

    # Tile sizes: tm multiple of 8 (sublane), tn/tk multiples of 128 (lane).
    tm = min(tm, _round_up(B, 8))
    tn = min(tn, _round_up(N, 128))
    tk = min(tk, _round_up(K, 128))

    B_pad = _round_up(B, tm)
    K_pad = _round_up(K, tk)
    N_pad = _round_up(N, tn)

    # Zero-pad to tile multiples (zeros contribute nothing to the dot; padded
    # output columns/rows are sliced away below).
    if (B_pad, K_pad) != (B, K):
        x = jnp.pad(x, ((0, B_pad - B), (0, K_pad - K)))
    if (K_pad, N_pad) != (K, N):
        wT = jnp.pad(wT, ((0, K_pad - K), (0, N_pad - N)))
    if N_pad != N:
        b2d = jnp.pad(b2d, ((0, 0), (0, N_pad - N)))

    grid = (B_pad // tm, N_pad // tn, K_pad // tk)

    cost = pl.CostEstimate(
        flops=2 * B_pad * K_pad * N_pad,
        transcendentals=0,
        bytes_accessed=4 * (B_pad * K_pad + K_pad * N_pad + B_pad * N_pad + N_pad),
    )

    out = pl.pallas_call(
        _mynn_block_kernel,
        out_shape=jax.ShapeDtypeStruct((B_pad, N_pad), x.dtype),
        grid=grid,
        in_specs=[
            pl.BlockSpec((tm, tk), lambda i, j, k: (i, k)),   # x tile
            pl.BlockSpec((tk, tn), lambda i, j, k: (k, j)),   # W^T tile
            pl.BlockSpec((1, tn), lambda i, j, k: (0, j)),    # bias: resident across K
        ],
        out_specs=pl.BlockSpec((tm, tn), lambda i, j, k: (i, j)),
        scratch_shapes=[pltpu.VMEM((tm, tn), jnp.float32)],
        compiler_params=pltpu.CompilerParams(
            dimension_semantics=("parallel", "parallel", "arbitrary"),
            vmem_limit_bytes=64 * 1024 * 1024,
        ),
        cost_estimate=cost,
    )(x, wT, b2d)

    return out[:B, :N]


def _reference(x, weight, bias):
    y = x @ weight.T + bias
    return jnp.where(y >= 0, y, 0.01 * y)


if __name__ == "__main__":
    key = jax.random.PRNGKey(0)

    # --- Case 1: small shapes matching the module's toy usage ---------------
    batch, in_dim, out_dim = 8, 32, 16
    k_x, k_w, k_b, key = jax.random.split(key, 4)
    bound = 1.0 / jnp.sqrt(jnp.float32(in_dim))
    weight = jax.random.uniform(k_w, (out_dim, in_dim), jnp.float32, -bound, bound)
    bias = jax.random.uniform(k_b, (out_dim,), jnp.float32, -bound, bound)
    x = jax.random.normal(k_x, (batch, in_dim), jnp.float32)

    out = mynn_block(x, weight, bias)
    jax.block_until_ready(out)
    ref = _reference(x, weight, bias)
    assert out.shape == ref.shape
    assert jnp.allclose(out, ref, atol=1e-5, rtol=1e-5), "mismatch vs reference (small)"

    # --- Case 2: larger shapes to exercise the full 3-D tiled grid ----------
    batch, in_dim, out_dim = 256, 640, 256
    k_x, k_w, k_b, key = jax.random.split(key, 4)
    bound = 1.0 / jnp.sqrt(jnp.float32(in_dim))
    weight = jax.random.uniform(k_w, (out_dim, in_dim), jnp.float32, -bound, bound)
    bias = jax.random.uniform(k_b, (out_dim,), jnp.float32, -bound, bound)
    x = jax.random.normal(k_x, (batch, in_dim), jnp.float32)

    out = mynn_block(x, weight, bias)
    jax.block_until_ready(out)
    ref = _reference(x, weight, bias)
    assert out.shape == ref.shape
    assert jnp.allclose(out, ref, atol=1e-4, rtol=1e-4), "mismatch vs reference (tiled)"

    print("KERNEL_OK")
</pallas_src>

<mosaic_0001>
module attributes {stable_mosaic.version = 11 : i64} {
  func.func @_mynn_block_kernel(%arg0: i32, %arg1: i32, %arg2: i32, %arg3: memref<8x128xf32, #tpu.memory_space<vmem>>, %arg4: memref<128x128xf32, #tpu.memory_space<vmem>>, %arg5: memref<1x128xf32, #tpu.memory_space<vmem>>, %arg6: memref<8x128xf32, #tpu.memory_space<vmem>>, %arg7: memref<8x128xf32, #tpu.memory_space<vmem>>) attributes {dimension_semantics = [#tpu.dimension_semantics<parallel>, #tpu.dimension_semantics<parallel>, #tpu.dimension_semantics<arbitrary>], iteration_bounds = array<i64: 1, 1, 1>, scalar_prefetch = 0 : i64, scratch_operands = 1 : i64, tpu.core_type = #tpu.core_type<tc>, window_params = [{transform_indices = @transform_0, window_bounds = array<i64: 8, 128>}, {transform_indices = @transform_1, window_bounds = array<i64: 128, 128>}, {transform_indices = @transform_2, window_bounds = array<i64: 1, 128>}, {transform_indices = @transform_3, window_bounds = array<i64: 8, 128>}]} {
    %c0_i32 = arith.constant 0 : i32
    %0 = arith.cmpi eq, %arg2, %c0_i32 : i32
    %1 = arith.extui %0 : i1 to i32
    %c0_i32_0 = arith.constant 0 : i32
    %2 = arith.cmpi ne, %1, %c0_i32_0 : i32
    scf.if %2 {
      %cst_10 = arith.constant 0.000000e+00 : f32
      %12 = vector.broadcast %cst_10 : f32 to vector<8x128xf32>
      %c0_11 = arith.constant 0 : index
      %c0_12 = arith.constant 0 : index
      %13 = vector.load %arg7[%c0_11, %c0_12] : memref<8x128xf32, #tpu.memory_space<vmem>>, vector<8x128xf32>
      tpu.vector_store %arg7[%c0_11, %c0_12], %12 {strides = array<i32>} : memref<8x128xf32, #tpu.memory_space<vmem>>, vector<8x128xf32>,
    } else {
    }
    %c0 = arith.constant 0 : index
    %c0_1 = arith.constant 0 : index
    %3 = vector.load %arg7[%c0, %c0_1] : memref<8x128xf32, #tpu.memory_space<vmem>>, vector<8x128xf32>
    %c0_2 = arith.constant 0 : index
    %c0_3 = arith.constant 0 : index
    %4 = vector.load %arg3[%c0_2, %c0_3] : memref<8x128xf32, #tpu.memory_space<vmem>>, vector<8x128xf32>
    %c0_4 = arith.constant 0 : index
    %c0_5 = arith.constant 0 : index
    %5 = vector.load %arg4[%c0_4, %c0_5] : memref<128x128xf32, #tpu.memory_space<vmem>>, vector<128x128xf32>
    %cst = arith.constant dense<0.000000e+00> : vector<8x128xf32>
    %6 = tpu.matmul %4, %5, %cst {dimension_numbers = #tpu.dot_dimension_numbers<[1], [0], [0], [1], [0, 0, 1, 1], [], []>} : vector<8x128xf32>, vector<128x128xf32>, vector<8x128xf32> -> vector<8x128xf32>
    %7 = arith.addf %3, %6 : vector<8x128xf32>
    %c0_6 = arith.constant 0 : index
    %c0_7 = arith.constant 0 : index
    %8 = vector.load %arg7[%c0_6, %c0_7] : memref<8x128xf32, #tpu.memory_space<vmem>>, vector<8x128xf32>
    tpu.vector_store %arg7[%c0_6, %c0_7], %7 {strides = array<i32>} : memref<8x128xf32, #tpu.memory_space<vmem>>, vector<8x128xf32>,
    %c0_i32_8 = arith.constant 0 : i32
    %9 = arith.cmpi eq, %arg2, %c0_i32_8 : i32
    %10 = arith.extui %9 : i1 to i32
    %c0_i32_9 = arith.constant 0 : i32
    %11 = arith.cmpi ne, %10, %c0_i32_9 : i32
    scf.if %11 {
      %c0_10 = arith.constant 0 : index
      %c0_11 = arith.constant 0 : index
      %12 = vector.load %arg7[%c0_10, %c0_11] : memref<8x128xf32, #tpu.memory_space<vmem>>, vector<8x128xf32>
      %c0_12 = arith.constant 0 : index
      %c0_13 = arith.constant 0 : index
      %13 = vector.load %arg5[%c0_12, %c0_13] : memref<1x128xf32, #tpu.memory_space<vmem>>, vector<1x128xf32>
      %14 = vector.broadcast %13 : vector<1x128xf32> to vector<8x128xf32>
      %15 = arith.addf %12, %14 : vector<8x128xf32>
      %cst_14 = arith.constant 0.000000e+00 : f32
      %16 = vector.broadcast %cst_14 : f32 to vector<8x128xf32>
      %17 = arith.cmpf oge, %15, %16 : vector<8x128xf32>
      %cst_15 = arith.constant 0.00999999977 : f32
      %18 = vector.broadcast %cst_15 : f32 to vector<8x128xf32>
      %19 = arith.mulf %18, %15 : vector<8x128xf32>
      %20 = arith.select %17, %15, %19 : vector<8x128xi1>, vector<8x128xf32>
      %c0_16 = arith.constant 0 : index
      %c0_17 = arith.constant 0 : index
      %21 = vector.load %arg6[%c0_16, %c0_17] : memref<8x128xf32, #tpu.memory_space<vmem>>, vector<8x128xf32>
      tpu.vector_store %arg6[%c0_16, %c0_17], %20 {strides = array<i32>} : memref<8x128xf32, #tpu.memory_space<vmem>>, vector<8x128xf32>,
    } else {
    }
    return
  }
  func.func @transform_0(%arg0: i32, %arg1: i32, %arg2: i32) -> (i32, i32) {
    %c0_i32 = arith.constant 0 : i32
    return %arg0, %arg2 : i32, i32
  }
  func.func @transform_1(%arg0: i32, %arg1: i32, %arg2: i32) -> (i32, i32) {
    %c0_i32 = arith.constant 0 : i32
    return %arg2, %arg1 : i32, i32
  }
  func.func @transform_2(%arg0: i32, %arg1: i32, %arg2: i32) -> (i32, i32) {
    %c0_i32 = arith.constant 0 : i32
    %c0_i32_0 = arith.constant 0 : i32
    return %c0_i32, %arg1 : i32, i32
  }
  func.func @transform_3(%arg0: i32, %arg1: i32, %arg2: i32) -> (i32, i32) {
    %c0_i32 = arith.constant 0 : i32
    return %arg0, %arg1 : i32, i32
  }
}

</mosaic_0001>

<bundles_post_ra>
// kernel: tpu_custom_call.1
= control target key start
LH: loop header
LB: loop body
LE: loop exit
PB: predicated region body
PF: predicated region fallthrough
CT: control target
= control target key end

     0   :  { %8 = vsyncpa [#allocation4], 0  ;;  %s436_s0 = inlined_call_operand.hbm [shape: f32[8,128], index: 0, kind: input, shape index: {}]   ;;  %s437_s1 = inlined_call_operand.hbm [shape: f32[128,128], index: 1, kind: input, shape index: {}]   ;;  %s438_s2 = inlined_call_operand.hbm [shape: f32[1,128], index: 2, kind: input, shape index: {}]   ;;  %s439_s3 = inlined_call_operand.hbm [shape: f32[8,128], index: 3, kind: output, shape index: {}]  }
   0x1   :  { %9 = vsyncpa [#allocation7], 0 }
   0x2   :  { %10 = vsyncpa [#allocation5], 0  ;;  %s359_s12 = smov [#allocation6]   ;;  %s265_s16 = scalar_lea.hbm %s437_s1, 2048 }
   0x3   :  { %s26_s13 = sshll.u32 %s359_s12, 4  ;;  %p266_p0 = scmp.ne.s32.totalorder %s437_s1, %s265_s16  ;;  %s27_s13 = int_to_ptr.vmem [resolvable:$true] %s26_s13 }
   0x4   :  { %p269_p1 = scmp.lt.u32.totalorder %s265_s16, %s437_s1 }
   0x6   :  { %p271_p2 = pnand %p269_p1, %p266_p0 }
   0x8   :  { %274 = shalt.err (!%p271_p2)
}
   0x9   :  { %s275_s21 = scalar_lea.vmem %s27_s13, 2048  ;;  %p280_p4 = scmp.lt.s32.totalorder %s27_s13, %s27_s13 }
   0xa   :  { %p276_p3 = scmp.ne.s32.totalorder %s27_s13, %s275_s21  ;;  %p281_p5 = scmp.lt.s32.totalorder %s275_s21, %s275_s21 }
   0xc   :  { %p282_p6 = por %p281_p5, %p280_p4 }
   0xe   :  { %p283_p7 = pnand %p282_p6, %p276_p3 }
  0x10   :  { %286 = shalt.err (!%p283_p7)
}
  0x11   :  { %s360_s22 = smov 128   ;;  %s361_s23 = smov 8  }
  0x12   :  { %32 = dma.hbm_to_vmem [thread:$0]  %s437_s1, 2048, %s27_s13, [#allocation7], %s360_s22, %s360_s22, %s361_s23  }
  0x13   :  { %s362_s26 = smov [#allocation3]   ;;  %s363_s28 = smov [#allocation8]  }
  0x14   :  { %s17_s27 = sshll.u32 %s362_s26, 4  ;;  %s39_s29 = sshll.u32 %s363_s28, 4  ;;  %s18_s27 = int_to_ptr.vmem [resolvable:$true] %s17_s27  ;;  %s40_s29 = int_to_ptr.vmem [resolvable:$true] %s39_s29 }
  0x15   :  { %s287_s5 = scalar_lea.hbm %s436_s0, 128 }
  0x16   :  { %p288_p8 = scmp.ne.s32.totalorder %s436_s0, %s287_s5  ;;  %p291_p9 = scmp.lt.u32.totalorder %s287_s5, %s436_s0 }
  0x18   :  { %p293_p10 = pnand %p291_p9, %p288_p8 }
  0x1a   :  { %296 = shalt.err (!%p293_p10)
}
  0x1b   :  { %s297_s1 = scalar_lea.vmem %s18_s27, 128  ;;  %p302_p12 = scmp.lt.s32.totalorder %s18_s27, %s18_s27 }
  0x1c   :  { %p298_p11 = scmp.ne.s32.totalorder %s18_s27, %s297_s1  ;;  %p303_p13 = scmp.lt.s32.totalorder %s297_s1, %s297_s1 }
  0x1e   :  { %p304_p0 = por %p303_p13, %p302_p12 }
  0x20   :  { %p305_p1 = pnand %p304_p0, %p298_p11 }
  0x22   :  { %308 = shalt.err (!%p305_p1)
}
  0x23   :  { %20 = dma.hbm_to_vmem [thread:$0]  %s436_s0, 128, %s18_s27, [#allocation4]  }
  0x24   :  { %s309_s14 = scalar_lea.hbm %s438_s2, 16 }
  0x25   :  { %p310_p2 = scmp.ne.s32.totalorder %s438_s2, %s309_s14  ;;  %p313_p3 = scmp.lt.u32.totalorder %s309_s14, %s438_s2 }
  0x27   :  { %p315_p4 = pnand %p313_p3, %p310_p2 }
  0x29   :  { %318 = shalt.err (!%p315_p4)
}
  0x2a   :  { %s319_s19 = scalar_lea.vmem %s40_s29, 16  ;;  %s323_s20 = scalar_lea.vmem %s40_s29, 32 }
  0x2b   :  { %p320_p5 = scmp.ne.s32.totalorder %s40_s29, %s319_s19  ;;  %p324_p6 = scmp.lt.s32.totalorder %s40_s29, %s40_s29 }
  0x2c   :  { %p325_p7 = scmp.lt.s32.totalorder %s323_s20, %s319_s19 }
  0x2e   :  { %p326_p8 = por %p325_p7, %p324_p6 }
  0x30   :  { %p327_p9 = pnand %p326_p8, %p320_p5 }
  0x32   :  { %330 = shalt.err (!%p327_p9)
}
  0x33   :  { %42 = dma.hbm_to_vmem [thread:$0]  %s438_s2, 16, %s40_s29, [#allocation7]  }
  0x34   :  { %353 = dma.done.wait [#allocation4], 128  }
  0x35   :  { %354 = vsyncadd [#allocation4], 4294967168 }
  0x36   :  { %355 = dma.done.wait [#allocation7], 2064  }
  0x37   :  { %356 = vsyncadd [#allocation7], 4294965232  ;;  %v364_v0 = vmov 0.0|0.0   ;;  %vm365_vm0 = vmmov 0   ;;  %v366_v1 = vmov 0.0   ;;  %v59_v2 = vld [vmem:[#allocation6] sm:$0xff] }
  0x38   :  { %232 = vmatprep.subr.bf16.mxu0 %v364_v0  ;;  %229 = vmatprep.mubr.msk.f32.mxu0 %vm365_vm0, %v366_v1  ;;  %v60_v3 = vld [vmem:[#allocation6 + $0x8] sm:$0xff]  ;;  %v61_v4 = vld [vmem:[#allocation6 + $0x10] sm:$0xff]  ;;  %v62_v6 = vld [vmem:[#allocation6 + $0x18] sm:$0xff]  ;;  %s367_s2 = smov [#allocation9]  }
  0x39   :  { %v233_v5 = vpack.c.bf16 %v60_v3, %v59_v2  ;;  %v236_v7 = vpack.c.bf16 %v62_v6, %v61_v4  ;;  %v63_v8 = vld [vmem:[#allocation6 + $0x20] sm:$0xff]  ;;  %v64_v9 = vld [vmem:[#allocation6 + $0x28] sm:$0xff]  ;;  %v65_v11 = vld [vmem:[#allocation6 + $0x30] sm:$0xff]  ;;  %s169_s22 = sshll.u32 %s367_s2, 4  ;;  %s170_s22 = int_to_ptr.vmem [resolvable:$true] %s169_s22 }
  0x3a   :  { %v239_v10 = vpack.c.bf16 %v64_v9, %v63_v8  ;;  %v66_v12 = vld [vmem:[#allocation6 + $0x38] sm:$0xff]  ;;  %v67_v14 = vld [vmem:[#allocation6 + $0x40] sm:$0xff]  ;;  %v68_v15 = vld [vmem:[#allocation6 + $0x48] sm:$0xff]  ;;  %s331_s23 = scalar_lea.vmem %s170_s22, 128  ;;  %p336_p11 = scmp.lt.s32.totalorder %s170_s22, %s170_s22 }
  0x3b   :  { %234 = vmatpush3.bf16.msra.mxu0 %v233_v5  ;;  %v242_v13 = vpack.c.bf16 %v66_v12, %v65_v11  ;;  %v245_v16 = vpack.c.bf16 %v68_v15, %v67_v14  ;;  %v69_v17 = vld [vmem:[#allocation6 + $0x50] sm:$0xff]  ;;  %v70_v18 = vld [vmem:[#allocation6 + $0x58] sm:$0xff]  ;;  %v71_v20 = vld [vmem:[#allocation6 + $0x60] sm:$0xff]  ;;  %p332_p10 = scmp.ne.s32.totalorder %s170_s22, %s331_s23  ;;  %p337_p12 = scmp.lt.s32.totalorder %s331_s23, %s331_s23 }
  0x3c   :  { %235 = vmatprep.subr.bf16.mxu0 %v364_v0  ;;  %v248_v19 = vpack.c.bf16 %v70_v18, %v69_v17  ;;  %v72_v21 = vld [vmem:[#allocation6 + $0x68] sm:$0xff]  ;;  %v73_v23 = vld [vmem:[#allocation6 + $0x70] sm:$0xff]  ;;  %v74_v24 = vld [vmem:[#allocation6 + $0x78] sm:$0xff] }
  0x3d   :  { %v251_v22 = vpack.c.bf16 %v72_v21, %v71_v20  ;;  %v254_v25 = vpack.c.bf16 %v74_v24, %v73_v23  ;;  %v58_v26 = vld [vmem:[#allocation3] sm:$0xff]  ;;  %v179_v27 = vld [vmem:[#allocation8] ss:$0 sm:$0xff]  ;;  %p338_p13 = por %p337_p12, %p336_p11 }
  0x3f   :  { %237 = vmatpush3.bf16.msra.mxu0 %v236_v7  ;;  %p339_p0 = pnand %p338_p13, %p332_p10 }
  0x40   :  { %238 = vmatprep.subr.bf16.mxu0 %v364_v0 }
  0x43   :  { %240 = vmatpush3.bf16.msra.mxu0 %v239_v10 }
  0x44   :  { %241 = vmatprep.subr.bf16.mxu0 %v364_v0 }
  0x47   :  { %243 = vmatpush3.bf16.msra.mxu0 %v242_v13 }
  0x48   :  { %244 = vmatprep.subr.bf16.mxu0 %v364_v0 }
  0x4b   :  { %246 = vmatpush3.bf16.msra.mxu0 %v245_v16 }
  0x4c   :  { %247 = vmatprep.subr.bf16.mxu0 %v364_v0 }
  0x4f   :  { %249 = vmatpush3.bf16.msra.mxu0 %v248_v19 }
  0x50   :  { %250 = vmatprep.subr.bf16.mxu0 %v364_v0 }
  0x53   :  { %252 = vmatpush3.bf16.msra.mxu0 %v251_v22 }
  0x54   :  { %253 = vmatprep.subr.bf16.mxu0 %v364_v0 }
  0x57   :  { %255 = vmatpush3.bf16.msra.mxu0 %v254_v25 }
  0x5a   :  { %230 = vmatmul.mubr.f32.vlgmr.msra.gmra.mrb[0].mxu0 %v58_v26 }
 0x12d   :  { %v141_v28 = vpop.f32.mrb[0].mxu0 }
 0x12e   :  { %v158_v29 = vadd.f32 %v179_v27, %v141_v28  ;;  %v231_v30 = vpop.f32.mrb[1].mxu0 }
 0x130   :  { %v160_v31 = vmul.f32 0.01, %v158_v29  ;;  %vm159_vm1 = vcmp.ge.f32.partialorder %v158_v29, 0.0 }
 0x132   :  { %v161_v32 = vsel %vm159_vm1, %v158_v29, %v160_v31 }
 0x133   :  { %162 = vst [vmem:[#allocation9] sm:$0xff] %v161_v32 }
 0x134   :  { %342 = shalt.err (!%p339_p0)
}
 0x135   :  { %s343_s26 = scalar_lea.hbm %s439_s3, 128 }
 0x136   :  { %p344_p1 = scmp.ne.s32.totalorder %s439_s3, %s343_s26  ;;  %p347_p2 = scmp.lt.u32.totalorder %s343_s26, %s439_s3 }
 0x138   :  { %p349_p3 = pnand %p347_p2, %p344_p1 }
 0x13a   :  { %352 = shalt.err (!%p349_p3)
}
 0x13b   :  { %172 = dma.vmem_to_hbm [thread:$0]  %s170_s22, 128, %s439_s3, [#allocation5]  }
 0x13c   :  { %357 = dma.done.wait [#allocation5], 128  }
 0x13d   :  { %358 = vsyncadd [#allocation5], 4294967168 }
 0x13e   :  { %176 = vsyncpa [#allocation4], 1 }
 0x13f   :  { %177 = vsyncpa [#allocation7], 1 }
 0x140   :  { %178 = vsyncpa [#allocation5], 1 }

</bundles_post_ra>
